<compile_context>
chip_gen: v6e
topology: v6e:2x2x1
jax: 0.10.0
libtpu: 0.0.40
codegen_flags: <defaults>
</compile_context>

<pallas_src>
import functools

import jax
import jax.numpy as jnp
import numpy as np
from jax.experimental import pallas as pl
from jax.experimental.pallas import tpu as pltpu


def _ce_tile_kernel(logits_ref, labels_ref, out_ref, *, ignore_index, hw, t):
    """One (C, T)-pixel tile of softmax cross-entropy, per-lane losses.

    logits_ref: (1, C, T)    classes on sublanes, pixels on lanes
    labels_ref: (1, 1, T)    int32 labels, pixels on lanes
    out_ref   : (1, 1, 1, T) per-lane masked loss for this (batch, tile) block
    """
    p = pl.program_id(1)

    x = logits_ref[0].astype(jnp.float32)          # (C, T) f32 (bf16 upcast in VMEM)
    lbl = labels_ref[0]                            # (1, T) int32

    # Valid pixel: inside the real H*W range (last tile may run past it) and
    # not ignore_index.  Garbage in the OOB tail only occupies whole masked
    # lanes; the final select never propagates NaN/Inf from unselected lanes,
    # so no pre-masking of the (C, T) tile is needed.
    pix = p * t + jax.lax.broadcasted_iota(jnp.int32, lbl.shape, 1)   # (1, T)
    mask = (pix < hw) & (lbl != ignore_index)                         # (1, T)

    # Stable log-sum-exp over the class (sublane) axis.
    m = jnp.max(x, axis=0, keepdims=True)                             # (1, T)
    lse = m + jnp.log(jnp.sum(jnp.exp(x - m), axis=0, keepdims=True)) # (1, T)

    # Gather logit at the label index via one-hot select (no dynamic gather on
    # TPU).  Labels outside [0, C) other than ignore_index yield picked=0
    # (loss = lse) instead of erroring like torch; harmless for this config.
    cls_ids = jax.lax.broadcasted_iota(jnp.int32, x.shape, 0)         # (C, T)
    picked = jnp.sum(jnp.where(cls_ids == lbl, x, 0.0),
                     axis=0, keepdims=True)                           # (1, T)

    out_ref[...] = jnp.where(mask, lse - picked, 0.0)[None, None]     # (1,1,1,T)


def _tpu_budgets():
    """(target logits-block bytes, scoped VMEM limit bytes), per TPU generation."""
    vmem_cap = None
    try:
        vmem_cap = getattr(pltpu.get_tpu_info(), "vmem_capacity_bytes", None)
    except Exception:
        vmem_cap = None
    if vmem_cap is None:
        vmem_cap = 64 * 1024 * 1024  # assume the tightest generation (v7x per-TC)
    if vmem_cap >= 100 * 1024 * 1024:
        # v5e / v6e: 128 MiB physical VMEM -> big blocks amortize per-step overhead.
        return 6 << 20, 64 * 1024 * 1024
    # v7x (64 MiB per TensorCore) or unknown: keep headroom for the
    # double-buffered logits, padded labels/output blocks and f32 upcast temps.
    return 3 << 20, 48 * 1024 * 1024


def _pick_pixel_tile(hw, c, dtype, *, target_bytes, max_t=32768):
    """Pixel-tile (lane) size from the actual VMEM footprint, multiple of 128."""
    if hw <= 128:
        return int(hw)                   # full dim: allowed even if not a mult of 128
    itemsize = int(jnp.dtype(dtype).itemsize)
    sub = max(8, 32 // itemsize)         # sublane packing: 8 (f32), 16 (bf16), 32 (i8)
    c_pad = -(-c // sub) * sub           # classes as stored in VMEM
    # Bytes per pixel lane: padded logits column + the 8-sublane-padded int32
    # labels block + the 8-sublane-padded f32 output block.
    bytes_per_t = c_pad * itemsize + 2 * 8 * 4
    t = (target_bytes // bytes_per_t) // 128 * 128
    t = max(128, min(t, max_t, (hw // 128) * 128))
    return int(t)


def cross_entropy_loss_forward(cls_score, label, *, loss_weight=1.0,
                               ignore_index=-100, pixel_tile=None):
    """Equivalent of CrossEntropyLoss()(cls_score, label) with default args.

    cls_score: float array [N, C, H, W].  f32 or bf16; bf16 is upcast to f32
               inside VMEM, so feeding bf16 halves HBM traffic on this
               memory-bound kernel -- prefer it when the producer is bf16.
    label:     int array   [N, H, W]
    Returns a scalar float32 loss.
    """
    # TODO(synk): class_weight / per-sample weight / avg_factor / use_sigmoid /
    # use_mask paths are not exercised by the default module config and are not
    # implemented.
    N, C, H, W = cls_score.shape
    HW = H * W
    M = N * HW

    target_bytes, vmem_limit = _tpu_budgets()
    t = pixel_tile if pixel_tile is not None else _pick_pixel_tile(
        HW, C, cls_score.dtype, target_bytes=target_bytes)
    num_tiles = pl.cdiv(HW, t)

    # NCHW consumed directly: collapse the trailing spatial dims only.  This is
    # a contiguous reshape (no transpose, no padding pass, no extra HBM copy).
    logits = cls_score.reshape(N, C, HW)
    labels = label.reshape(N, 1, HW).astype(jnp.int32)

    partial = pl.pallas_call(
        functools.partial(_ce_tile_kernel,
                          ignore_index=ignore_index, hw=HW, t=t),
        # One independent (1, T) slab per (batch, pixel-tile): no cross-step
        # accumulator, so both grid axes are truly parallel (v7x megacore can
        # shard the pixel axis even when N == 1).
        out_shape=jax.ShapeDtypeStruct((N, num_tiles, 1, t), jnp.float32),
        grid_spec=pltpu.PrefetchScalarGridSpec(
            num_scalar_prefetch=0,
            grid=(N, num_tiles),
            in_specs=[
                pl.BlockSpec((1, C, t), lambda n, p: (n, 0, p)),
                pl.BlockSpec((1, 1, t), lambda n, p: (n, 0, p)),
            ],
            out_specs=pl.BlockSpec((1, 1, 1, t), lambda n, p: (n, p, 0, 0)),
        ),
        compiler_params=pltpu.CompilerParams(
            dimension_semantics=("parallel", "parallel"),
            vmem_limit_bytes=vmem_limit,
        ),
    )(logits, labels)

    # mmseg weight_reduce_loss 'mean' divides by the TOTAL pixel count
    # (ignored pixels contribute 0 to the numerator but count in the denom).
    return jnp.float32(loss_weight) * (jnp.sum(partial) / jnp.float32(M))


def _reference_loss(cls_score, label, loss_weight=1.0, ignore_index=-100):
    """Pure-JAX reference mirroring F.cross_entropy(reduction='none') + mean()."""
    N, C, H, W = cls_score.shape
    logits = jnp.transpose(cls_score, (0, 2, 3, 1)).reshape(-1, C).astype(jnp.float32)
    lbl = label.reshape(-1)
    lse = jax.scipy.special.logsumexp(logits, axis=-1)
    safe_lbl = jnp.where(lbl == ignore_index, 0, lbl)
    picked = jnp.take_along_axis(logits, safe_lbl[:, None], axis=-1)[:, 0]
    per_px = jnp.where(lbl == ignore_index, 0.0, lse - picked)
    return loss_weight * jnp.mean(per_px)


if __name__ == "__main__":
    key = jax.random.PRNGKey(0)

    # --- case 1: small canonical shape, f32 ---
    k1, k2, k3, key = *jax.random.split(key, 3), key
    N, C, H, W = 2, 4, 16, 16
    cls_score = jax.random.normal(k1, (N, C, H, W), dtype=jnp.float32)
    label = jax.random.randint(k2, (N, H, W), 0, C, dtype=jnp.int32)
    ignore_mask = jax.random.uniform(k3, (N, H, W)) < 0.1
    label = jnp.where(ignore_mask, jnp.int32(-100), label)

    loss = jax.block_until_ready(cross_entropy_loss_forward(cls_score, label))
    ref = jax.block_until_ready(_reference_loss(cls_score, label))
    np.testing.assert_allclose(np.asarray(loss), np.asarray(ref),
                               rtol=1e-5, atol=1e-5)

    # --- case 2: bf16 logits (upcast happens inside the kernel) ---
    cls_bf16 = cls_score.astype(jnp.bfloat16)
    loss_b = jax.block_until_ready(cross_entropy_loss_forward(cls_bf16, label))
    ref_b = jax.block_until_ready(_reference_loss(cls_bf16, label))
    np.testing.assert_allclose(np.asarray(loss_b), np.asarray(ref_b),
                               rtol=1e-4, atol=1e-4)

    # --- case 3: ragged spatial size (H*W = 130 -> two tiles, OOB tail lanes
    #             masked only at the final select, per-tile output blocks) ---
    k4, k5, k6, key = *jax.random.split(key, 3), key
    N2, C2, H2, W2 = 1, 5, 10, 13
    cls2 = jax.random.normal(k4, (N2, C2, H2, W2), dtype=jnp.float32)
    lbl2 = jax.random.randint(k5, (N2, H2, W2), 0, C2, dtype=jnp.int32)
    ign2 = jax.random.uniform(k6, (N2, H2, W2)) < 0.2
    lbl2 = jnp.where(ign2, jnp.int32(-100), lbl2)

    loss2 = jax.block_until_ready(cross_entropy_loss_forward(cls2, lbl2))
    ref2 = jax.block_until_ready(_reference_loss(cls2, lbl2))
    np.testing.assert_allclose(np.asarray(loss2), np.asarray(ref2),
                               rtol=1e-5, atol=1e-5)

    # --- case 4: larger multi-tile case with an explicit small tile, forces
    #             several pixel tiles per image through the parallel grid ---
    k7, k8, key = *jax.random.split(key, 2), key
    N3, C3, H3, W3 = 2, 19, 24, 32           # HW = 768 -> 3 tiles of 256
    cls3 = jax.random.normal(k7, (N3, C3, H3, W3), dtype=jnp.float32)
    lbl3 = jax.random.randint(k8, (N3, H3, W3), 0, C3, dtype=jnp.int32)
    loss3 = jax.block_until_ready(
        cross_entropy_loss_forward(cls3, lbl3, pixel_tile=256))
    ref3 = jax.block_until_ready(_reference_loss(cls3, lbl3))
    np.testing.assert_allclose(np.asarray(loss3), np.asarray(ref3),
                               rtol=1e-5, atol=1e-5)

    print("KERNEL_OK")
</pallas_src>

<mosaic_0001>
module attributes {stable_mosaic.version = 11 : i64} {
  func.func @_ce_tile_kernel(%arg0: i32, %arg1: i32, %arg2: memref<1x4x256xf32, #tpu.memory_space<vmem>>, %arg3: memref<1x1x256xi32, #tpu.memory_space<vmem>>, %arg4: memref<1x1x1x256xf32, #tpu.memory_space<vmem>>) attributes {dimension_semantics = [#tpu.dimension_semantics<parallel>, #tpu.dimension_semantics<parallel>], iteration_bounds = array<i64: 2, 1>, scalar_prefetch = 0 : i64, scratch_operands = 0 : i64, tpu.core_type = #tpu.core_type<tc>, window_params = [{transform_indices = @transform_0, window_bounds = array<i64: 1, 4, 256>}, {transform_indices = @transform_1, window_bounds = array<i64: 1, 1, 256>}, {transform_indices = @transform_2, window_bounds = array<i64: 1, 1, 1, 256>}]} {
    %c0 = arith.constant 0 : index
    %c0_0 = arith.constant 0 : index
    %c0_1 = arith.constant 0 : index
    %0 = vector.load %arg2[%c0, %c0_0, %c0_1] : memref<1x4x256xf32, #tpu.memory_space<vmem>>, vector<1x4x256xf32>
    %1 = vector.shape_cast %0 : vector<1x4x256xf32> to vector<4x256xf32>
    %c0_2 = arith.constant 0 : index
    %c0_3 = arith.constant 0 : index
    %c0_4 = arith.constant 0 : index
    %2 = vector.load %arg3[%c0_2, %c0_3, %c0_4] : memref<1x1x256xi32, #tpu.memory_space<vmem>>, vector<1x1x256xi32>
    %3 = vector.shape_cast %2 : vector<1x1x256xi32> to vector<1x256xi32>
    %c256_i32 = arith.constant 256 : i32
    %4 = arith.muli %arg1, %c256_i32 : i32
    %5 = tpu.iota {dimensions = array<i32: 1>} : vector<1x256xi32>
    %6 = vector.broadcast %4 : i32 to vector<1x256xi32>
    %7 = arith.addi %6, %5 : vector<1x256xi32>
    %c256_i32_5 = arith.constant 256 : i32
    %8 = vector.broadcast %c256_i32_5 : i32 to vector<1x256xi32>
    %9 = arith.cmpi slt, %7, %8 : vector<1x256xi32>
    %c-100_i32 = arith.constant -100 : i32
    %10 = vector.broadcast %c-100_i32 : i32 to vector<1x256xi32>
    %11 = arith.cmpi ne, %3, %10 : vector<1x256xi32>
    %12 = arith.andi %9, %11 : vector<1x256xi1>
    %cst = arith.constant dense<0xFF800000> : vector<256xf32>
    %13 = vector.multi_reduction <maximumf>, %1, %cst [0] : vector<4x256xf32> to vector<256xf32>
    %14 = vector.shape_cast %13 : vector<256xf32> to vector<1x256xf32>
    %15 = vector.broadcast %14 : vector<1x256xf32> to vector<4x256xf32>
    %16 = arith.subf %1, %15 : vector<4x256xf32>
    %17 = math.exp %16 : vector<4x256xf32>
    %cst_6 = arith.constant dense<0.000000e+00> : vector<256xf32>
    %18 = vector.multi_reduction <add>, %17, %cst_6 [0] : vector<4x256xf32> to vector<256xf32>
    %19 = vector.shape_cast %18 : vector<256xf32> to vector<1x256xf32>
    %20 = math.log %19 : vector<1x256xf32>
    %21 = arith.addf %14, %20 : vector<1x256xf32>
    %22 = tpu.iota {dimensions = array<i32: 0>} : vector<4x256xi32>
    %23 = vector.broadcast %3 : vector<1x256xi32> to vector<4x256xi32>
    %24 = arith.cmpi eq, %22, %23 : vector<4x256xi32>
    %cst_7 = arith.constant 0.000000e+00 : f32
    %25 = vector.broadcast %cst_7 : f32 to vector<4x256xf32>
    %26 = arith.select %24, %1, %25 : vector<4x256xi1>, vector<4x256xf32>
    %cst_8 = arith.constant dense<0.000000e+00> : vector<256xf32>
    %27 = vector.multi_reduction <add>, %26, %cst_8 [0] : vector<4x256xf32> to vector<256xf32>
    %28 = vector.shape_cast %27 : vector<256xf32> to vector<1x256xf32>
    %29 = arith.subf %21, %28 : vector<1x256xf32>
    %cst_9 = arith.constant 0.000000e+00 : f32
    %30 = vector.broadcast %cst_9 : f32 to vector<1x256xf32>
    %31 = arith.select %12, %29, %30 : vector<1x256xi1>, vector<1x256xf32>
    %32 = vector.shape_cast %31 : vector<1x256xf32> to vector<1x1x1x256xf32>
    %c0_10 = arith.constant 0 : index
    %c0_11 = arith.constant 0 : index
    %c0_12 = arith.constant 0 : index
    %c0_13 = arith.constant 0 : index
    %33 = vector.load %arg4[%c0_10, %c0_11, %c0_12, %c0_13] : memref<1x1x1x256xf32, #tpu.memory_space<vmem>>, vector<1x1x1x256xf32>
    tpu.vector_store %arg4[%c0_10, %c0_11, %c0_12, %c0_13], %32 {strides = array<i32>} : memref<1x1x1x256xf32, #tpu.memory_space<vmem>>, vector<1x1x1x256xf32>,
    return
  }
  func.func @transform_0(%arg0: i32, %arg1: i32) -> (i32, i32, i32) {
    %c0_i32 = arith.constant 0 : i32
    %c0_i32_0 = arith.constant 0 : i32
    return %arg0, %c0_i32, %arg1 : i32, i32, i32
  }
  func.func @transform_1(%arg0: i32, %arg1: i32) -> (i32, i32, i32) {
    %c0_i32 = arith.constant 0 : i32
    %c0_i32_0 = arith.constant 0 : i32
    return %arg0, %c0_i32, %arg1 : i32, i32, i32
  }
  func.func @transform_2(%arg0: i32, %arg1: i32) -> (i32, i32, i32, i32) {
    %c0_i32 = arith.constant 0 : i32
    %c0_i32_0 = arith.constant 0 : i32
    %c0_i32_1 = arith.constant 0 : i32
    return %arg0, %arg1, %c0_i32, %c0_i32_0 : i32, i32, i32, i32
  }
}

</mosaic_0001>

<bundles_post_ra>
// kernel: tpu_custom_call.1
= control target key start
LH: loop header
LB: loop body
LE: loop exit
PB: predicated region body
PF: predicated region fallthrough
CT: control target
= control target key end

     0   :  { %7 = vsyncpa [#allocation3], 0  ;;  %s913_s0 = inlined_call_operand.hbm [shape: f32[2,4,256], index: 0, kind: input, shape index: {}]   ;;  %s914_s1 = inlined_call_operand.hbm [shape: s32[2,1,256], index: 1, kind: input, shape index: {}]   ;;  %s915_s2 = inlined_call_operand.hbm [shape: f32[2,1,1,256], index: 2, kind: output, shape index: {}]  }
   0x1   :  { %9 = vsyncpa [#allocation3 + $0x1], 0 }
   0x2   :  { %10 = vsyncpa [#allocation6], 0 }
   0x3   :  { %12 = vsyncpa [#allocation6 + $0x1], 0 }
   0x4   :  { %13 = vsyncpa [#allocation4], 0 }
   0x5   :  { %15 = vsyncpa [#allocation4 + $0x1], 0  ;;  %s737_s9 = smov 0   ;;  %s739_s10 = smov 0  }
   0x6   :  { %s741_s11 = smov 0   ;;  %s743_s12 = smov 0  }
   0x7   :  { %s745_s13 = smov 0   ;;  %s747_s14 = smov 0  }
   0x8 LB: > { %s477_s15 = sadd.s32 4294967295, %s715_s14   ;;  %s478_s16 = sadd.s32 4294967294, %s715_s14   ;;  %s715_s14 = sphi %s747_s14, %s21_s14   ;;  %s711_s13 = sphi %s745_s13, %s927_s13   ;;  %s707_s12 = sphi %s743_s12, %s926_s12   ;;  %s703_s11 = sphi %s741_s11, %s925_s11   ;;  %s699_s10 = sphi %s739_s10, %s924_s10   ;;  %s695_s9 = sphi %s737_s9, %s923_s9  }
   0x9   : > { %s33_s17 = sadd.s32 1, %s711_s13  ;;  %s42_s18 = sadd.s32 1, %s703_s11 }
   0xa   : > { %p35_p0 = scmp.ge.s32.totalorder %s33_s17, 2  ;;  %p49_p1 = scmp.ne.s32.totalorder %s703_s11, %s699_s10 }
   0xb   : > { %p50_p2 = scmp.eq.s32.totalorder %s715_s14, 0  ;;  %p55_p3 = scmp.ne.s32.totalorder %s699_s10, %s695_s9 }
   0xc   : > { %s929_s17 = smov (%p35_p0, %s33_s17), 0  ;;  %p56_p5 = scmp.eq.s32.totalorder %s477_s15, 0 }
   0xd   : > { %p778_p4 = por %p50_p2, %p49_p1  ;;  %s37_s20 = ssub.s32 %s711_s13, %s929_s17 }
   0xe   : > { %p109_p6 = scmp.eq.s32.totalorder %s477_s15, 1  ;;  %p40_p7 = scmp.eq.s32.totalorder %s37_s20, 0 }
   0xf   : > { %p784_p8 = por %p56_p5, %p55_p3  ;;  %p115_p10 = scmp.eq.s32.totalorder %s478_s16, 1 }
  0x10   : > { %p788_p9 = por %p109_p6, %p49_p1  ;;  %p516_p13 = scmp.lt.s32.totalorder %s715_s14, 2 }
  0x11   : > { %s793_s23 = scalar_select %p40_p7, %s703_s11, %s42_s18  }
  0x12   : > { %p795_p11 = por %p115_p10, %p55_p3  ;;  %s802_s25 = sand.u32 1, %s703_s11  }
  0x13   : > { %s481_s26 = sshll.u32 %s802_s25, 3  ;;  %s496_s27 = sshll.u32 %s711_s13, 7 }
  0x14   : > { %s147_s30 = scalar_lea.hbm %s913_s0, %s496_s27  ;;  %s139_s3 = scalar_lea.vmem [#allocation2], %s481_s26 }
  0x15   : > { %s149_s4 = sshll.u32 %s139_s3, 4  ;;  %p811_p0 = pnand %p516_p13, %p778_p4  ;;  %s150_s4 = int_to_ptr.vmem [resolvable:$true] %s149_s4 }
  0x16   : > { %p487_p1 = scmp.ge.s32.totalorder %s715_s14, 1  ;;  %p175_p2 = scmp.lt.s32.totalorder %s715_s14, 3 }
  0x17   : > { %s136_s6 = scalar_lea.sflag [#allocation3], %s802_s25  ;;  %p577_p3 = pneg %p811_p0 }
  0x18   : > { %s588_s7 = scalar_lea.vmem %s150_s4, 128  ;;  %s717_s8 = smov [#allocation2]  }
  0x19   : > { %p589_p5 = scmp.ne.s32.totalorder %s150_s4, %s588_s7  ;;  %s593_s15 = sshll.u32 %s717_s8, 4  ;;  %s594_s15 = int_to_ptr.vmem [resolvable:$false] %s593_s15 }
  0x1a   : > { %s595_s16 = scalar_lea.vmem %s594_s15, 256  ;;  %p596_p4 = scmp.lt.s32.totalorder %s150_s4, %s594_s15 }
  0x1b   : > { %p591_p6 = pnand %p589_p5, %p577_p3  ;;  %p597_p10 = scmp.lt.s32.totalorder %s595_s16, %s588_s7 }
  0x1d   : > { %p592_p7 = pneg %p591_p6  ;;  %p598_p13 = por %p597_p10, %p596_p4 }
  0x1f   : > { %p599_p12 = pnand %p598_p13, %p592_p7 }
  0x21   : > { %602 = shalt.err (!%p599_p12)
}
  0x22   : > { %508 = dma.hbm_to_vmem [thread:$0]  (!%p811_p0), %s147_s30, 128, %s150_s4, %s136_s6  }
  0x23   : > { %p829_p5 = pnand %p487_p1, %p175_p2  ;;  %s484_s19 = sshll.u32 %s802_s25, 1 }
  0x24   : > { %s497_s20 = sshll.u32 %s711_s13, 5  ;;  %s160_s29 = scalar_lea.vmem [#allocation5], %s484_s19 }
  0x25   : > { %s168_s28 = scalar_lea.hbm %s914_s1, %s497_s20  ;;  %s170_s3 = sshll.u32 %s160_s29, 4  ;;  %s171_s3 = int_to_ptr.vmem [resolvable:$true] %s170_s3 }
  0x26   : > { %s157_s7 = scalar_lea.sflag [#allocation6], %s802_s25  ;;  %s616_s8 = scalar_lea.vmem %s171_s3, 32 }
  0x27   : > { %p617_p12 = scmp.ne.s32.totalorder %s171_s3, %s616_s8  ;;  %s718_s30 = smov [#allocation5]  }
  0x28   : > { %s621_s4 = sshll.u32 %s718_s30, 4  ;;  %s622_s4 = int_to_ptr.vmem [resolvable:$false] %s621_s4 }
  0x29   : > { %p619_p6 = pnand %p617_p12, %p577_p3  ;;  %s623_s6 = scalar_lea.vmem %s622_s4, 64 }
  0x2a   : > { %p624_p1 = scmp.lt.s32.totalorder %s171_s3, %s622_s4  ;;  %p625_p2 = scmp.lt.s32.totalorder %s623_s6, %s616_s8 }
  0x2b   : > { %p620_p7 = pneg %p619_p6 }
  0x2c   : > { %p626_p4 = por %p625_p2, %p624_p1 }
  0x2e   : > { %p627_p10 = pnand %p626_p4, %p620_p7 }
  0x30   : > { %630 = shalt.err (!%p627_p10)
}
  0x31   : > { %511 = dma.hbm_to_vmem [thread:$0]  (!%p811_p0), %s168_s28, 32, %s171_s3, %s157_s7  }
  0x32   : > { %179 = sbr.rel (%p829_p5) target bundleno = 150 (0x96), region = 28  ;;  %s847_s25 = sand.u32 (!%p829_p5), 1, %s699_s10  }
  0x33   : > { %s488_s15 = sshll.u32 (!%p829_p5), %s847_s25, 3  ;;  %s182_s16 = scalar_lea.sflag (!%p829_p5), [#allocation3], %s847_s25 }
  0x34   : > { %s185_s19 = scalar_lea.vmem (!%p829_p5), [#allocation2], %s488_s15 }
  0x37   : > { %682 = dma.done.wait (%p784_p8), %s182_s16, 128  }
  0x38   : > { %684 = vsyncadd (%p784_p8), %s182_s16, 4294967168  ;;  %s489_s5 = sshll.u32 %s847_s25, 1  ;;  %s191_s18 = scalar_lea.sflag [#allocation6], %s847_s25 }
  0x39   : > { %s194_s20 = scalar_lea.vmem [#allocation5], %s489_s5 }
  0x3a   : > { %686 = dma.done.wait (%p784_p8), %s191_s18, 32  }
  0x3b   : > { %688 = vsyncadd (%p784_p8), %s191_s18, 4294967264  ;;  %vm250_vm0 = vcmask 1043456   ;;  %v222_v0 = vld [vmem:[%s185_s19] sm:$0xff]  ;;  %v235_v17 = vlaneseq  ;;  %v223_v22 = vld [vmem:[%s194_s20] sm:$0x3]  ;;  %v719_v54 = vmov 0  }
  0x3c   : > { %v248_v1 = vcombine.high %v222_v0, %v222_v0  ;;  %v251_v2 = vsel %vm250_vm0, %v222_v0, -inf  ;;  %vm233_vm3 = vcmp.ne.s32.totalorder %v223_v22, 4294967196  ;;  %v720_v60 = vmov 1966171168   ;;  %s219_s21 = scalar_lea.vmem [#allocation7], %s489_s5  ;;  %s498_s27 = sshll.u32 %s707_s12, 5 }
  0x3d   : > { %v252_v3 = vrot.slane %v251_v2, 4  ;;  %v236_v20 = vshrl.u32 %v235_v17, 7  ;;  %v234_v55 = vsel %vm233_vm3, 1, %v719_v54  ;;  %v331_v61 = vunpack.c.l.s4 %v720_v60  ;;  %s367_s26 = sshll.u32 %s219_s21, 4  ;;  %s365_s3 = scalar_lea.hbm %s915_s2, %s498_s27  ;;  %s368_s26 = int_to_ptr.vmem [resolvable:$true] %s367_s26 }
  0x3e   : > { %v258_v4 = vsel %vm250_vm0, %v248_v1, -inf  ;;  %vm347_vm6 = vcmp.lt.s32.totalorder %v235_v17, 256  ;;  %s351_s7 = scalar_lea.sflag [#allocation4], %s847_s25  ;;  %s631_s8 = scalar_lea.vmem %s368_s26, 32 }
  0x3f   : > { %v253_v5 = vmax.f32 %v251_v2, %v252_v3  ;;  %v259_v6 = vrot.slane %v258_v4, 4  ;;  %v237_v21 = vsub.s32 0, %v236_v20  ;;  %v241_v23 = vsub.s32 1, %v236_v20  ;;  %p632_p8 = scmp.ne.s32.totalorder %s368_s26, %s631_s8  ;;  %s721_s30 = smov [#allocation7]  }
  0x40   : > { %s635_s4 = sshll.u32 %s721_s30, 4  ;;  %s636_s4 = int_to_ptr.vmem [resolvable:$false] %s635_s4 }
  0x41   : > { %v254_v7 = vrot.slane %v253_v5, 2  ;;  %v260_v8 = vmax.f32 %v258_v4, %v259_v6  ;;  %v300_v24 = vrot.slane %v223_v22, %v237_v21  ;;  %v304_v25 = vrot.slane %v223_v22, %v241_v23  ;;  %p633_p0 = pnand %p632_p8, %p788_p9  ;;  %s637_s12 = scalar_lea.vmem %s636_s4, 64 }
  0x42   : > { %v238_v59 = vrot.slane %v234_v55, %v237_v21  ;;  %p638_p13 = scmp.lt.s32.totalorder %s368_s26, %s636_s4  ;;  %p639_p5 = scmp.lt.s32.totalorder %s637_s12, %s631_s8 }
  0x43   : > { %v255_v9 = vmax.f32 %v253_v5, %v254_v7  ;;  %v261_v10 = vrot.slane %v260_v8, 2  ;;  %vm305_vm1 = vcmp.eq.s32.totalorder %v236_v20, %v300_v24  ;;  %vm306_vm2 = vcmp.eq.s32.totalorder %v236_v20, %v304_v25  ;;  %p634_p3 = pneg %p633_p0 }
  0x44   : > { %v307_v30 = vsel %vm305_vm1, %v222_v0, 0.0  ;;  %v308_v34 = vsel %vm306_vm2, %v248_v1, 0.0  ;;  %v242_v1 = vrot.slane %v234_v55, %v241_v23  ;;  %vm243_vm4 = vcmp.ne.s32.totalorder %v238_v59, 0  ;;  %p640_p12 = por %p639_p5, %p638_p13 }
  0x45   : > { %v256_v11 = vrot.slane %v255_v9, 1  ;;  %v262_v12 = vmax.f32 %v260_v8, %v261_v10  ;;  %v309_v35 = vsel %vm250_vm0, %v307_v30, 0.0  ;;  %v316_v38 = vsel %vm250_vm0, %v308_v34, 0.0 }
  0x46   : > { %v310_v41 = vrot.slane %v309_v35, 4  ;;  %v317_v44 = vrot.slane %v316_v38, 4  ;;  %v332_v5 = vunpack.c.0.s8 %v331_v61  ;;  %vm244_vm5 = vcmp.ne.s32.totalorder %v242_v1, 0  ;;  %p641_p6 = pnand %p640_p12, %p634_p3 }
  0x47   : > { %v257_v13 = vmax.f32 %v255_v9, %v256_v11  ;;  %v263_v14 = vrot.slane %v262_v12, 1 }
  0x48   : > { %v311_v47 = vadd.f32 %v310_v41, %v309_v35  ;;  %v318_v49 = vadd.f32 %v317_v44, %v316_v38  ;;  %v335_v10 = vsub.s32 %v332_v5, %v236_v20 }
  0x49   : > { %v264_v15 = vmax.f32 %v262_v12, %v263_v14 }
  0x4a   : > { %v312_v50 = vrot.slane %v311_v47, 2  ;;  %v319_v51 = vrot.slane %v318_v49, 2 }
  0x4b   : > { %v267_v16 = vcombine.low %v257_v13, %v264_v15 }
  0x4c   : > { %v313_v52 = vadd.f32 %v312_v50, %v311_v47  ;;  %v320_v53 = vadd.f32 %v319_v51, %v318_v49 }
  0x4d   : > { %v269_v18 = vsub.f32 %v222_v0, %v267_v16 }
  0x4e   : > { %v314_v56 = vrot.slane %v313_v52, 1  ;;  %v321_v57 = vrot.slane %v320_v53, 1 }
  0x4f   : > { %v270_v19 = vmul.f32 1.442695, %v269_v18 }
  0x50   : > { %v315_v63 = vadd.f32 %v314_v56, %v313_v52  ;;  %v322_v4 = vadd.f32 %v321_v57, %v320_v53 }
  0x51   : > { %569 = vpow2.f32 %v270_v19 }
  0x5e   : > { %v570_v26 = vpop.eup %569 }
  0x5f   : > { %v273_v27 = vcombine.high %v570_v26, %v570_v26  ;;  %v275_v28 = vsel %vm250_vm0, %v570_v26, 0.0 }
  0x60   : > { %v276_v29 = vrot.slane %v275_v28, 4 }
  0x61   : > { %v282_v31 = vsel %vm250_vm0, %v273_v27, 0.0 }
  0x62   : > { %v277_v32 = vadd.f32 %v276_v29, %v275_v28  ;;  %v283_v33 = vrot.slane %v282_v31, 4 }
  0x64   : > { %v278_v36 = vrot.slane %v277_v32, 2  ;;  %v284_v37 = vadd.f32 %v283_v33, %v282_v31 }
  0x66   : > { %v279_v39 = vadd.f32 %v278_v36, %v277_v32  ;;  %v285_v40 = vrot.slane %v284_v37, 2 }
  0x68   : > { %v280_v42 = vrot.slane %v279_v39, 1  ;;  %v286_v43 = vadd.f32 %v285_v40, %v284_v37 }
  0x6a   : > { %v281_v45 = vadd.f32 %v280_v42, %v279_v39  ;;  %v287_v46 = vrot.slane %v286_v43, 1 }
  0x6c   : > { %v288_v48 = vadd.f32 %v287_v46, %v286_v43  ;;  %571 = vlog2.f32 %v281_v45 }
  0x6e   : > { %573 = vlog2.f32 %v288_v48 }
  0x79   : > { %v572_v58 = vpop.eup %571 }
  0x7a   : > { %v290_v62 = vmul.f32 0.6931472, %v572_v58 }
  0x7b   : > { %v574_v0 = vpop.eup %573 }
  0x7c   : > { %v292_v2 = vmul.f32 0.6931472, %v574_v0  ;;  %v293_v3 = vadd.f32 %v290_v62, %v257_v13 }
  0x7e   : > { %v294_v6 = vadd.f32 %v292_v2, %v264_v15  ;;  %v323_v7 = vsub.f32 %v293_v3, %v315_v63 }
  0x80   : > { %v324_v8 = vsub.f32 %v294_v6, %v322_v4  ;;  %v325_v9 = vsel %vm243_vm4, %v323_v7, 0.0 }
  0x82   : > { %v326_v11 = vsel %vm244_vm5, %v324_v8, 0.0 }
  0x83   : > { %v329_v12 = vcombine.low %v325_v9, %v326_v11 }
  0x85   : > { %v336_v14 = vrot.slane %v329_v12, %v335_v10 }
  0x87   : > { %v343_v13 = vrot.slane %v336_v14, %v335_v10 }
  0x89   : > { %349 = vst.msk [vmem:[%s219_s21] sm:$0x3] %vm347_vm6, %v343_v13 }
  0x8a   : > { %644 = shalt.err (!%p641_p6)
}
  0x8b   : > { %s645_s6 = scalar_lea.hbm %s365_s3, 32  ;;  %s649_s16 = scalar_lea.hbm %s915_s2, 64 }
  0x8c   : > { %p646_p7 = scmp.ne.s32.totalorder %s365_s3, %s645_s6  ;;  %p650_p4 = scmp.lt.s32.totalorder %s365_s3, %s915_s2 }
  0x8d   : > { %p651_p10 = scmp.lt.s32.totalorder %s649_s16, %s645_s6 }
  0x8e   : > { %p647_p1 = pnand %p646_p7, %p788_p9 }
  0x8f   : > { %p652_p8 = por %p651_p10, %p650_p4 }
  0x90   : > { %p648_p2 = pneg %p647_p1 }
  0x92   : > { %p653_p0 = pnand %p652_p8, %p648_p2 }
  0x94   : > { %656 = shalt.err (!%p653_p0)
}
  0x95   : > { %503 = dma.vmem_to_hbm [thread:$0]  (%p788_p9), %s368_s26, 32, %s365_s3, %s351_s7  }
  0x96 PF: > { %s379_s18 = sand.u32 1, %s695_s9   ;;  %p922_p3 = scmp.ge.s32.totalorder %s715_s14, 2 }
  0x97   : > { %s380_s20 = scalar_lea.sflag [#allocation4], %s379_s18 }
  0x98   : > { %p513_p13 = pnand %p922_p3, %p795_p11 }
  0x9a   : > { %p514_p5 = pneg %p513_p13 }
  0x9c   : > { %690 = dma.done.wait (%p514_p5), %s380_s20, 32  }
  0x9d   : > { %692 = vsyncadd (%p514_p5), %s380_s20, 4294967264  ;;  %s21_s14 = sadd.s32 1, %s715_s14   ;;  %s923_s9 = smov %s699_s10 }
  0x9e   : > { %p18_p12 = scmp.ge.s32.totalorder %s21_s14, 4   ;;  %s924_s10 = smov %s703_s11 }
  0x9f   : > { %s925_s11 = smov %s793_s23  ;;  %s926_s12 = smov %s711_s13 }
  0xa0   : > { %s927_s13 = smov %s929_s17  ;;  %20 = sbr.rel (!%p18_p12) target bundleno = 8 (0x8), region = 86 }
  0xa5   :  { %385 = vsyncpa [#allocation3], 1 }
  0xa6   :  { %387 = vsyncpa [#allocation3 + $0x1], 1 }
  0xa7   :  { %388 = vsyncpa [#allocation6], 1 }
  0xa8   :  { %390 = vsyncpa [#allocation6 + $0x1], 1 }
  0xa9   :  { %391 = vsyncpa [#allocation4], 1 }
  0xaa   :  { %393 = vsyncpa [#allocation4 + $0x1], 1 }

</bundles_post_ra>
